<compile_context>
chip_gen: v6e
topology: v6e:2x2x1
jax: 0.10.0
libtpu: 0.0.40
codegen_flags: <defaults>
</compile_context>

<pallas_src>
import functools
import math

import numpy as np
import jax
import jax.numpy as jnp
from jax import lax
from jax.experimental import pallas as pl
from jax.experimental.pallas import tpu as pltpu


def _round_up(v, m):
    return ((v + m - 1) // m) * m


def _probe_roll_sign():
    """Probe pltpu.roll's direction once, eagerly (must run outside jit).

    Returns sign s such that pltpu.roll(x, (s*k) % n, axis=-1)[:, i] gives
    x[:, (i + k) % n] for the shifts used in the kernel.
    """
    def kern(x_ref, o_ref):
        o_ref[...] = pltpu.roll(x_ref[...], 1, axis=1)

    x = jnp.broadcast_to(jnp.arange(128, dtype=jnp.float32), (8, 128))
    y = pl.pallas_call(
        kern, out_shape=jax.ShapeDtypeStruct((8, 128), jnp.float32))(x)
    # np.roll convention: element 0 moves to index 1.
    return -1 if float(y[0, 1]) == 0.0 else 1


# ---------------------------------------------------------------------------
# Fused RUNet kernel: one grid step == one branch (land / sea); the output is
# an accumulator shared by both steps (DRUNet's a + b happens in-kernel).
# Activation layout: (C, N_pad) with N = B*(H+2)*(W+2) padded to a multiple of
# 128 lanes; flat index b*(H+2)*(W+2) + y*(W+2) + x, padding ring kept at zero
# (re-masked after each conv whose output feeds another conv directly).
# ---------------------------------------------------------------------------
def _runet_fused_kernel(
    x_ref,          # (1, C_in, Nf) f32  input (padded-flat layout)
    dn_ref,         # (Nf, Nh)      bf16 stride-2 selection matrix
    up_ref,         # (Nh, Nf)      bf16 nearest-x2 expansion matrix
    mask_ref,       # (1, Nf)       f32  1.0 at valid (non-padding) positions
    wh_ref, bh_ref, ah_ref,          # head: (1,3,F,3*C_in), (1,F,1), (1,F,1)
    we_ref, be_ref, ae_ref,          # encoder
    wm_ref, bm_ref, am_ref,          # bottleneck
    wd_ref, bd_ref, ad_ref,          # decoder
    wt_ref, bt_ref,                  # tail: (1,3,C_in,3*F), (1,C_in,1)
    o_ref,          # (C_in, Nf) f32  accumulated over both branches
    *, wp_full, wp_half, roll_sign):
    mask = mask_ref[...]                                   # (1, Nf)

    def lane_shift(v, s):
        # result[:, i] == v[:, (i + s) mod n]; one XLU rotation (no vld/vst).
        n = v.shape[-1]
        amt = (roll_sign * s) % n
        if amt == 0:
            return v
        return pltpu.roll(v, amt, axis=1)

    def conv3x3(x, w_ref_, b_ref_, a_ref_, wp, out_mask):
        # im2col split by dy: 3 MXU matmuls of K = 3*C_in, f32 accumulation.
        acc = None
        for dy in range(3):
            row = lane_shift(x, (dy - 1) * wp)             # f32 row shift
            taps = [lane_shift(row, dx - 1).astype(jnp.bfloat16)
                    for dx in range(3)]
            patch = jnp.concatenate(taps, axis=0)          # (3*C_in, N) bf16
            part = jnp.dot(w_ref_[0, dy], patch,
                           preferred_element_type=jnp.float32)
            acc = part if acc is None else acc + part
        acc = acc + b_ref_[0]                              # (C_out, 1) bias
        if a_ref_ is not None:                             # PReLU, learnable slope
            acc = jnp.where(acc >= 0.0, acc, a_ref_[0] * acc)
        if out_mask is not None:                           # re-zero padding ring
            acc = acc * out_mask
        return acc

    x = x_ref[0]                                           # (C_in, Nf) f32

    # head: C_in -> F
    f0 = conv3x3(x, wh_ref, bh_ref, ah_ref, wp_full, mask)
    # encoder: stride-2 conv == stride-1 conv sampled at even positions;
    # subsampling is a 0/1 selection matmul (no strided lane gather).
    e = conv3x3(f0, we_ref, be_ref, ae_ref, wp_full, None)
    d1 = jnp.dot(e.astype(jnp.bfloat16), dn_ref[...],
                 preferred_element_type=jnp.float32)       # (F, Nh)
    # bottleneck at half resolution
    m = conv3x3(d1, wm_ref, bm_ref, am_ref, wp_half, None)
    # decoder: nearest x2 upsample (selection matmul), conv, encoder skip
    upx = jnp.dot(m.astype(jnp.bfloat16), up_ref[...],
                  preferred_element_type=jnp.float32)      # (F, Nf), clean ring
    u = conv3x3(upx, wd_ref, bd_ref, ad_ref, wp_full, mask) + f0
    # tail: F -> C_in (ring left unmasked: cropped outside), global residual
    out = conv3x3(u, wt_ref, bt_ref, None, wp_full, None)
    contrib = out + x

    step = pl.program_id(0)

    @pl.when(step == 0)
    def _():
        o_ref[...] = contrib

    @pl.when(step != 0)
    def _():
        o_ref[...] = o_ref[...] + contrib                  # DRUNet: a + b


# ---------------------------------------------------------------------------
# Host-side packing helpers (static layout plumbing, runs at trace time).
# ---------------------------------------------------------------------------
def _pack_conv_weight(w):
    """(C_out, C_in, 3, 3) -> (3, C_out, 3*C_in) bf16; [dy, o, dx*C_in + ci]."""
    c_out, c_in = w.shape[:2]
    wt = jnp.transpose(w, (2, 3, 1, 0)).reshape(3, 3 * c_in, c_out)
    return jnp.transpose(wt, (0, 2, 1)).astype(jnp.bfloat16)


def _to_padded_flat(x, n_pad):
    """(B, C, H, W) f32 -> (C, n_pad) f32: zero ring + zero lane padding."""
    B, C, H, W = x.shape
    xp = jnp.pad(x, ((0, 0), (0, 0), (1, 1), (1, 1)))
    flat = jnp.transpose(xp, (1, 0, 2, 3)).reshape(C, B * (H + 2) * (W + 2))
    return jnp.pad(flat, ((0, 0), (0, n_pad - flat.shape[1])))


def _resample_constants(B, H, W, nf_pad, nh_pad):
    """Kronecker-built stride-2 selection, nearest-x2 expansion, valid mask."""
    Hp, Wp = H + 2, W + 2
    H2, W2 = H // 2, W // 2
    Hp2, Wp2 = H2 + 2, W2 + 2

    r_dn = np.zeros((Hp, Hp2), np.float32)
    c_dn = np.zeros((Wp, Wp2), np.float32)
    r_up = np.zeros((Hp2, Hp), np.float32)
    c_up = np.zeros((Wp2, Wp), np.float32)
    for y2 in range(H2):
        r_dn[2 * y2 + 1, y2 + 1] = 1.0
    for x2 in range(W2):
        c_dn[2 * x2 + 1, x2 + 1] = 1.0
    for y in range(1, H + 1):
        r_up[(y - 1) // 2 + 1, y] = 1.0
    for x in range(1, W + 1):
        c_up[(x - 1) // 2 + 1, x] = 1.0
    rv = np.zeros((Hp,), np.float32)
    cv = np.zeros((Wp,), np.float32)
    rv[1:H + 1] = 1.0
    cv[1:W + 1] = 1.0

    eye_b = np.eye(B, dtype=np.float32)
    dn = np.kron(eye_b, np.kron(r_dn, c_dn))           # (B*Hp*Wp, B*Hp2*Wp2)
    up = np.kron(eye_b, np.kron(r_up, c_up))           # (B*Hp2*Wp2, B*Hp*Wp)
    mask = np.kron(np.ones((B,), np.float32), np.kron(rv, cv))[None, :]

    dn = np.pad(dn, ((0, nf_pad - dn.shape[0]), (0, nh_pad - dn.shape[1])))
    up = np.pad(up, ((0, nh_pad - up.shape[0]), (0, nf_pad - up.shape[1])))
    mask = np.pad(mask, ((0, 0), (0, nf_pad - mask.shape[1])))
    return (jnp.asarray(dn, jnp.bfloat16), jnp.asarray(up, jnp.bfloat16),
            jnp.asarray(mask, jnp.float32))


# ---------------------------------------------------------------------------
# DRUNet forward: one fused pallas_call, grid=(2,) over the land/sea branches,
# output accumulated in-kernel (a + b).
# ---------------------------------------------------------------------------
def drunet_forward(p_land, p_sea, land, sea, *, roll_sign=-1):
    B, C_in, H, W = land.shape
    assert sea.shape == land.shape and H % 2 == 0 and W % 2 == 0
    F = p_land["w_head"].shape[0]
    Hp, Wp = H + 2, W + 2
    H2, W2 = H // 2, W // 2
    Hp2, Wp2 = H2 + 2, W2 + 2
    Nf, Nh = B * Hp * Wp, B * Hp2 * Wp2
    Nf_pad = _round_up(Nf, 128)
    Nh_pad = _round_up(Nh, 128)

    dn, up, mask = _resample_constants(B, H, W, Nf_pad, Nh_pad)
    x = jnp.stack([_to_padded_flat(land, Nf_pad),
                   _to_padded_flat(sea, Nf_pad)], 0)

    def stack2(fn, name):
        return jnp.stack([fn(p_land[name]), fn(p_sea[name])], 0)

    col = lambda v: v.reshape(-1, 1).astype(jnp.float32)
    wh = stack2(_pack_conv_weight, "w_head")
    we = stack2(_pack_conv_weight, "w_enc")
    wm = stack2(_pack_conv_weight, "w_mid")
    wd = stack2(_pack_conv_weight, "w_dec")
    wt = stack2(_pack_conv_weight, "w_tail")
    bh, be, bm, bd, bt = [stack2(col, n)
                          for n in ("b_head", "b_enc", "b_mid", "b_dec", "b_tail")]
    ah, ae, am, ad = [stack2(col, n) for n in ("a_head", "a_enc", "a_mid", "a_dec")]

    def per_branch(*shape):
        return pl.BlockSpec((1,) + shape, lambda i: (i,) + (0,) * len(shape))

    def shared(*shape):
        # Constant index_map: the block never changes across grid steps.
        return pl.BlockSpec(shape, lambda i: (0,) * len(shape))

    kernel = functools.partial(_runet_fused_kernel, wp_full=Wp, wp_half=Wp2,
                               roll_sign=roll_sign)

    macs = (F * 9 * C_in * Nf_pad            # head
            + F * 9 * F * Nf_pad             # encoder
            + F * Nf_pad * Nh_pad            # stride-2 selection
            + F * 9 * F * Nh_pad             # bottleneck
            + F * Nh_pad * Nf_pad            # nearest-x2 expansion
            + F * 9 * F * Nf_pad             # decoder
            + C_in * 9 * F * Nf_pad)         # tail
    args = (x, dn, up, mask, wh, bh, ah, we, be, ae,
            wm, bm, am, wd, bd, ad, wt, bt)
    bytes_accessed = int(sum(int(a.size) * a.dtype.itemsize for a in args)
                         + C_in * Nf_pad * 4)
    cost = pl.CostEstimate(flops=2 * 2 * macs, transcendentals=0,
                           bytes_accessed=bytes_accessed)

    out = pl.pallas_call(
        kernel,
        out_shape=jax.ShapeDtypeStruct((C_in, Nf_pad), jnp.float32),
        grid=(2,),
        in_specs=[
            per_branch(C_in, Nf_pad),                                    # x
            shared(Nf_pad, Nh_pad),                                      # dn
            shared(Nh_pad, Nf_pad),                                      # up
            shared(1, Nf_pad),                                           # mask
            per_branch(3, F, 3 * C_in), per_branch(F, 1), per_branch(F, 1),  # head
            per_branch(3, F, 3 * F), per_branch(F, 1), per_branch(F, 1),     # enc
            per_branch(3, F, 3 * F), per_branch(F, 1), per_branch(F, 1),     # mid
            per_branch(3, F, 3 * F), per_branch(F, 1), per_branch(F, 1),     # dec
            per_branch(3, C_in, 3 * F), per_branch(C_in, 1),                 # tail
        ],
        out_specs=pl.BlockSpec((C_in, Nf_pad), lambda i: (0, 0)),        # accumulator
        compiler_params=pltpu.CompilerParams(
            dimension_semantics=("arbitrary",),       # serial: output accumulates
            vmem_limit_bytes=64 * 1024 * 1024),
        cost_estimate=cost,
    )(*args)

    # Strip lane padding, crop the zero ring; sum over branches already done.
    out = out[:, :Nf].reshape(C_in, B, Hp, Wp)[:, :, 1:H + 1, 1:W + 1]
    return jnp.transpose(out, (1, 0, 2, 3))         # (B, C_in, H, W)


# ---------------------------------------------------------------------------
# Pure-JAX reference (same math / same bf16 rounding points) for validation.
# ---------------------------------------------------------------------------
def _conv3x3_ref(x, w, b, alpha):
    y = lax.conv_general_dilated(
        x.astype(jnp.bfloat16), w.astype(jnp.bfloat16),
        window_strides=(1, 1), padding=((1, 1), (1, 1)),
        dimension_numbers=("NCHW", "OIHW", "NCHW"),
        preferred_element_type=jnp.float32)
    y = y + b[None, :, None, None]
    if alpha is not None:
        y = jnp.where(y >= 0.0, y, alpha[None, :, None, None] * y)
    return y


def runet_reference(p, x):
    f0 = _conv3x3_ref(x, p["w_head"], p["b_head"], p["a_head"])
    e = _conv3x3_ref(f0, p["w_enc"], p["b_enc"], p["a_enc"])
    d1 = e[:, :, ::2, ::2]
    m = _conv3x3_ref(d1, p["w_mid"], p["b_mid"], p["a_mid"])
    up = jnp.repeat(jnp.repeat(m, 2, axis=2), 2, axis=3)
    u = _conv3x3_ref(up, p["w_dec"], p["b_dec"], p["a_dec"]) + f0
    return _conv3x3_ref(u, p["w_tail"], p["b_tail"], None) + x


def drunet_reference(p_land, p_sea, land, sea):
    return runet_reference(p_land, land) + runet_reference(p_sea, sea)


# ---------------------------------------------------------------------------
# Deterministic parameter init (PReLU slope is a real parameter, init 0.25).
# ---------------------------------------------------------------------------
def init_runet_params(key, in_ch, feats):
    ks = jax.random.split(key, 10)

    def conv_init(kw, kb, c_out, c_in):
        fan_in = c_in * 9
        scale = 1.0 / math.sqrt(fan_in)
        w = jax.random.normal(kw, (c_out, c_in, 3, 3), jnp.float32) * scale
        b = jax.random.normal(kb, (c_out,), jnp.float32) * scale
        return w, b

    p = {}
    p["w_head"], p["b_head"] = conv_init(ks[0], ks[1], feats, in_ch)
    p["w_enc"], p["b_enc"] = conv_init(ks[2], ks[3], feats, feats)
    p["w_mid"], p["b_mid"] = conv_init(ks[4], ks[5], feats, feats)
    p["w_dec"], p["b_dec"] = conv_init(ks[6], ks[7], feats, feats)
    p["w_tail"], p["b_tail"] = conv_init(ks[8], ks[9], in_ch, feats)
    # TODO(synk): nn.PReLU default is one shared slope; per-channel covers it.
    for name in ("a_head", "a_enc", "a_mid", "a_dec"):
        p[name] = jnp.full((feats,), 0.25, jnp.float32)
    return p


if __name__ == "__main__":
    in_channels, num_feats = 4, 32
    B, H, W = 2, 16, 16

    key = jax.random.PRNGKey(0)
    k_land, k_sea, k_pl, k_ps = jax.random.split(key, 4)
    land = jax.random.normal(k_land, (B, in_channels, H, W), jnp.float32)
    sea = jax.random.normal(k_sea, (B, in_channels, H, W), jnp.float32)

    p_land = init_runet_params(k_pl, in_channels, num_feats)
    p_sea = init_runet_params(k_ps, in_channels, num_feats)

    roll_sign = _probe_roll_sign()                     # eager, outside jit
    fwd = jax.jit(functools.partial(drunet_forward, roll_sign=roll_sign))
    out = fwd(p_land, p_sea, land, sea)
    jax.block_until_ready(out)
    assert out.shape == (B, in_channels, H, W) and out.dtype == jnp.float32

    ref = jax.jit(drunet_reference)(p_land, p_sea, land, sea)
    err = float(jnp.max(jnp.abs(out - ref)))
    # Both paths use bf16 MXU operands with f32 accumulation; differences are
    # accumulation-order noise only.
    assert err < 5e-2, f"kernel vs reference max abs err = {err}"
    print("KERNEL_OK")
</pallas_src>

<mosaic_0001>
module attributes {stable_mosaic.version = 11 : i64} {
  func.func @kern(%arg0: memref<8x128xf32, #tpu.memory_space<vmem>>, %arg1: memref<8x128xf32, #tpu.memory_space<vmem>>) attributes {dimension_semantics = [], scalar_prefetch = 0 : i64, scratch_operands = 0 : i64, tpu.core_type = #tpu.core_type<tc>} {
    %c0 = arith.constant 0 : index
    %c0_0 = arith.constant 0 : index
    %0 = vector.load %arg0[%c0, %c0_0] : memref<8x128xf32, #tpu.memory_space<vmem>>, vector<8x128xf32>
    %c1_i32 = arith.constant 1 : i32
    %1 = tpu.dynamic_rotate %0 by %c1_i32 dim 1 : vector<8x128xf32>, i32 -> vector<8x128xf32>
    %c0_1 = arith.constant 0 : index
    %c0_2 = arith.constant 0 : index
    %2 = vector.load %arg1[%c0_1, %c0_2] : memref<8x128xf32, #tpu.memory_space<vmem>>, vector<8x128xf32>
    tpu.vector_store %arg1[%c0_1, %c0_2], %1 {strides = array<i32>} : memref<8x128xf32, #tpu.memory_space<vmem>>, vector<8x128xf32>,
    return
  }
}

</mosaic_0001>

<bundles_post_ra>
// kernel: tpu_custom_call.1
= control target key start
LH: loop header
LB: loop body
LE: loop exit
PB: predicated region body
PF: predicated region fallthrough
CT: control target
= control target key end

     0   :  { %6 = vsyncpa [#allocation3], 0  ;;  %s106_s0 = inlined_call_operand.hbm [shape: f32[8,128], index: 0, kind: input, shape index: {}]   ;;  %s107_s1 = inlined_call_operand.hbm [shape: f32[8,128], index: 1, kind: output, shape index: {}]  }
   0x1   :  { %7 = vsyncpa [#allocation4], 0  ;;  %s87_s6 = smov [#allocation2]  }
   0x2   :  { %s14_s7 = sshll.u32 %s87_s6, 4  ;;  %s15_s7 = int_to_ptr.vmem [resolvable:$true] %s14_s7 }
   0x3   :  { %s51_s8 = scalar_lea.vmem %s15_s7, 128  ;;  %p56_p1 = scmp.lt.s32.totalorder %s15_s7, %s15_s7 }
   0x4   :  { %p52_p0 = scmp.ne.s32.totalorder %s15_s7, %s51_s8  ;;  %p57_p2 = scmp.lt.s32.totalorder %s51_s8, %s51_s8 }
   0x6   :  { %p58_p3 = por %p57_p2, %p56_p1 }
   0x8   :  { %p59_p4 = pnand %p58_p3, %p52_p0 }
   0xa   :  { %62 = shalt.err (!%p59_p4)
}
   0xb   :  { %17 = dma.hbm_to_vmem [thread:$0]  %s106_s0, 128, %s15_s7, [#allocation3]  }
   0xc   :  { %83 = dma.done.wait [#allocation3], 128  }
   0xd   :  { %84 = vsyncadd [#allocation3], 4294967168  ;;  %v21_v0 = vld [vmem:[#allocation2] sm:$0xff]  ;;  %s88_s11 = smov 1   ;;  %s89_s12 = smov [#allocation5]  }
   0xe   :  { %22 = vrot.lane.b32.xlu0 %v21_v0, %s88_s11  ;;  %s31_s13 = sshll.u32 %s89_s12, 4  ;;  %s32_s13 = int_to_ptr.vmem [resolvable:$true] %s31_s13 }
   0xf   :  { %s63_s14 = scalar_lea.vmem %s32_s13, 128  ;;  %p68_p6 = scmp.lt.s32.totalorder %s32_s13, %s32_s13 }
  0x10   :  { %p64_p5 = scmp.ne.s32.totalorder %s32_s13, %s63_s14  ;;  %p69_p7 = scmp.lt.s32.totalorder %s63_s14, %s63_s14 }
  0x12   :  { %p70_p8 = por %p69_p7, %p68_p6 }
  0x14   :  { %p71_p9 = pnand %p70_p8, %p64_p5 }
  0x80   :  { %v23_v1 = vpop.permute.xlu0 %22 }
  0x81   :  { %24 = vst [vmem:[#allocation5] sm:$0xff] %v23_v1 }
  0x82   :  { %74 = shalt.err (!%p71_p9)
}
  0x83   :  { %34 = dma.vmem_to_hbm [thread:$0]  %s32_s13, 128, %s107_s1, [#allocation4]  }
  0x84   :  { %85 = dma.done.wait [#allocation4], 128  }
  0x85   :  { %86 = vsyncadd [#allocation4], 4294967168 }
  0x86   :  { %38 = vsyncpa [#allocation3], 1 }
  0x87   :  { %39 = vsyncpa [#allocation4], 1 }

</bundles_post_ra>
